<compile_context>
chip_gen: v7x
topology: tpu7x:2x2x1
jax: 0.10.0
libtpu: 0.0.40
codegen_flags: <defaults>
</compile_context>

<pallas_src>
import jax
import jax.numpy as jnp
from jax.experimental import pallas as pl
from jax.experimental.pallas import tpu as pltpu

_BLOCK_COLS_CANDIDATES = (1024, 512, 256, 128)   # lane-dense last dim choices
_MAX_BLOCK_ROWS = 512                            # 2 MiB f32 tiles at 1024 cols
_VMEM_LIMIT_BYTES = 32 * 1024 * 1024             # fits v5e/v6e/v7x physical VMEM


# ----------------------------------------------------------------------------
# Kernels
# ----------------------------------------------------------------------------
def _uni2bi_scalar_acc_kernel(acc_ref, x_ref, out_ref, new_acc_ref):
    # acc_ref: (1,) f32 scalar in SMEM (fresh / broadcast accumulator).
    acc = x_ref[...].astype(jnp.float32) + (acc_ref[0] + 1.0)
    out = (acc >= 2.0).astype(jnp.float32)
    out_ref[...] = out
    new_acc_ref[...] = acc - 2.0 * out


def _uni2bi_array_acc_kernel(x_ref, acc_ref, out_ref, new_acc_ref):
    # acc_ref: per-element accumulator state streamed from HBM.
    acc = acc_ref[...] + x_ref[...].astype(jnp.float32) + 1.0
    out = (acc >= 2.0).astype(jnp.float32)
    out_ref[...] = out
    new_acc_ref[...] = acc - 2.0 * out


def _uni2bi_fused_step(x_ref, out_ref, acc_out_ref, acc_vmem):
    # One bitstream step with the accumulator resident in VMEM scratch.
    acc = acc_vmem[...] + x_ref[...].astype(jnp.float32) + 1.0
    out = (acc >= 2.0).astype(jnp.float32)
    out_ref[...] = out
    acc = acc - 2.0 * out
    acc_vmem[...] = acc

    @pl.when(pl.program_id(1) == pl.num_programs(1) - 1)
    def _():
        acc_out_ref[...] = acc


def _uni2bi_fused_scalar_kernel(acc_in_ref, x_ref, out_ref, acc_out_ref, acc_vmem):
    @pl.when(pl.program_id(1) == 0)
    def _():
        acc_vmem[...] = jnp.full_like(acc_vmem, acc_in_ref[0])
    _uni2bi_fused_step(x_ref, out_ref, acc_out_ref, acc_vmem)


def _uni2bi_fused_array_kernel(acc_in_ref, x_ref, out_ref, acc_out_ref, acc_vmem):
    @pl.when(pl.program_id(1) == 0)
    def _():
        acc_vmem[...] = acc_in_ref[...]
    _uni2bi_fused_step(x_ref, out_ref, acc_out_ref, acc_vmem)


# ----------------------------------------------------------------------------
# Layout planning
# ----------------------------------------------------------------------------
def _choose_layout(total):
    """Pick (cols, rows, block_rows, padded_total) for a lane-dense 2-D slab."""
    cols = None
    for c in _BLOCK_COLS_CANDIDATES:
        if total % c == 0:
            cols = c
            break
    if cols is None:
        cols = 128
        padded = -(-total // cols) * cols          # pad fallback (rare)
    else:
        padded = total
    rows = padded // cols

    if rows > _MAX_BLOCK_ROWS:
        # Big arrays: 2 MiB tiles; uneven tail handled by Pallas edge masking.
        block_rows = _MAX_BLOCK_ROWS
    elif rows % 64 == 0 and rows * cols * 4 >= (1 << 20):
        # Mid-size single-block case: split into 2 grid steps so v7x's second
        # TensorCore gets work (block_rows stays a multiple of 32 for any dtype).
        block_rows = rows // 2
    else:
        block_rows = max(rows, 1)                  # full-extent block (always legal)
    return cols, rows, block_rows, padded


def _to_slab(flat, padded_total, rows, cols):
    if flat.shape[0] != padded_total:
        flat = jnp.pad(flat, (0, padded_total - flat.shape[0]))
    return flat.reshape(rows, cols)


# ----------------------------------------------------------------------------
# Single-step wrapper (== one forward() of the torch module)
# ----------------------------------------------------------------------------
def uni2bi_forward(x, accumulator):
    """One Uni2Bi forward pass.

    Args:
      x: array (any float/int dtype, e.g. NCHW unipolar bitstream in {0, 1}).
      accumulator: float array; either shape (1,) (fresh state) or x.shape
        (per-element state carried from a previous call).
    Returns:
      (output, new_accumulator), both of shape x.shape, float32.
    """
    orig_shape = x.shape
    total = x.size
    cols, rows, block_rows, padded = _choose_layout(total)
    x2d = _to_slab(x.reshape(-1), padded, rows, cols)

    grid = (pl.cdiv(rows, block_rows),)
    blk = pl.BlockSpec((block_rows, cols), lambda i: (i, 0))
    out_shape = (jax.ShapeDtypeStruct((rows, cols), jnp.float32),
                 jax.ShapeDtypeStruct((rows, cols), jnp.float32))
    cparams = pltpu.CompilerParams(dimension_semantics=("parallel",),
                                   vmem_limit_bytes=_VMEM_LIMIT_BYTES)

    if accumulator.size == 1:
        # Fresh / scalar accumulator: keep it in SMEM; no full-size HBM read stream.
        acc_scalar = accumulator.astype(jnp.float32).reshape(1)
        out2d, new_acc2d = pl.pallas_call(
            _uni2bi_scalar_acc_kernel,
            out_shape=out_shape,
            grid=grid,
            in_specs=[pl.BlockSpec(memory_space=pltpu.MemorySpace.SMEM), blk],
            out_specs=(blk, blk),
            compiler_params=cparams,
        )(acc_scalar, x2d)
    else:
        # Per-element accumulator state: stream it, donate its buffer to new_acc.
        acc_full = jnp.broadcast_to(accumulator, orig_shape).astype(jnp.float32)
        acc2d = _to_slab(acc_full.reshape(-1), padded, rows, cols)
        out2d, new_acc2d = pl.pallas_call(
            _uni2bi_array_acc_kernel,
            out_shape=out_shape,
            grid=grid,
            in_specs=[blk, blk],
            out_specs=(blk, blk),
            input_output_aliases={1: 1},   # acc input buffer -> new_acc output
            compiler_params=cparams,
        )(x2d, acc2d)

    if padded == total:
        return out2d.reshape(orig_shape), new_acc2d.reshape(orig_shape)
    output = out2d.reshape(-1)[:total].reshape(orig_shape)
    new_acc = new_acc2d.reshape(-1)[:total].reshape(orig_shape)
    return output, new_acc


# ----------------------------------------------------------------------------
# Fused T-step wrapper (accumulator held in VMEM across the whole bitstream)
# ----------------------------------------------------------------------------
def uni2bi_forward_steps(xs, accumulator):
    """Fused Uni2Bi over a T-step bitstream.

    Args:
      xs: array of shape (T, *x_shape) — the bitstream, any float/int dtype.
      accumulator: shape (1,) or x_shape float state.
    Returns:
      (outputs, final_accumulator): outputs (T, *x_shape) f32, state x_shape f32.
    """
    T = xs.shape[0]
    step_shape = xs.shape[1:]
    total = 1
    for d in step_shape:
        total *= d
    cols, rows, block_rows, padded = _choose_layout(total)

    xs_flat = xs.reshape(T, -1)
    if padded != total:
        xs_flat = jnp.pad(xs_flat, ((0, 0), (0, padded - total)))
    xs3d = xs_flat.reshape(T, rows, cols)

    grid = (pl.cdiv(rows, block_rows), T)   # T innermost ("arbitrary"), rows parallel
    x_spec = pl.BlockSpec((None, block_rows, cols), lambda i, t: (t, i, 0))
    out_spec = pl.BlockSpec((None, block_rows, cols), lambda i, t: (t, i, 0))
    acc_spec = pl.BlockSpec((block_rows, cols), lambda i, t: (i, 0))

    out_shape = (jax.ShapeDtypeStruct((T, rows, cols), jnp.float32),
                 jax.ShapeDtypeStruct((rows, cols), jnp.float32))
    cparams = pltpu.CompilerParams(dimension_semantics=("parallel", "arbitrary"),
                                   vmem_limit_bytes=_VMEM_LIMIT_BYTES)
    scratch = [pltpu.VMEM((block_rows, cols), jnp.float32)]

    if accumulator.size == 1:
        acc_in = accumulator.astype(jnp.float32).reshape(1)
        in_specs = [pl.BlockSpec(memory_space=pltpu.MemorySpace.SMEM), x_spec]
        kernel = _uni2bi_fused_scalar_kernel
    else:
        acc_full = jnp.broadcast_to(accumulator, step_shape).astype(jnp.float32)
        acc_in = _to_slab(acc_full.reshape(-1), padded, rows, cols)
        in_specs = [acc_spec, x_spec]
        kernel = _uni2bi_fused_array_kernel

    outs3d, acc2d = pl.pallas_call(
        kernel,
        out_shape=out_shape,
        grid=grid,
        in_specs=in_specs,
        out_specs=(out_spec, acc_spec),
        scratch_shapes=scratch,
        compiler_params=cparams,
    )(acc_in, xs3d)

    if padded == total:
        outputs = outs3d.reshape((T,) + step_shape)
        final_acc = acc2d.reshape(step_shape)
    else:
        outputs = outs3d.reshape(T, -1)[:, :total].reshape((T,) + step_shape)
        final_acc = acc2d.reshape(-1)[:total].reshape(step_shape)
    return outputs, final_acc


# ----------------------------------------------------------------------------
# Demo / correctness check
# ----------------------------------------------------------------------------
if __name__ == "__main__":
    key = jax.random.PRNGKey(0)
    k1, k2, k3 = jax.random.split(key, 3)
    B, C, H, W = 2, 4, 16, 16
    T = 8

    # Unipolar bitstream inputs (values in {0, 1}), float like torch.float.
    x1 = jax.random.bernoulli(k1, p=0.5, shape=(B, C, H, W)).astype(jnp.float32)
    x2 = jax.random.bernoulli(k2, p=0.5, shape=(B, C, H, W)).astype(jnp.float32)
    xs = jax.random.bernoulli(k3, p=0.5, shape=(T, B, C, H, W)).astype(jnp.float32)

    # Parameter init identical to the module: accumulator = zeros(1), no grad.
    accumulator = jnp.zeros((1,), jnp.float32)

    # Reference in plain JAX (mirrors the PyTorch forward exactly).
    def ref_step(acc, x):
        acc = jnp.broadcast_to(acc, x.shape) + x.astype(jnp.float32) + 1.0
        out = (acc >= 2.0).astype(jnp.float32)
        return out, acc - 2.0 * out

    # --- Single-step path: fresh scalar acc, then full per-element acc state.
    out1, acc1 = uni2bi_forward(x1, accumulator)
    out2, acc2 = uni2bi_forward(x2, acc1)
    jax.block_until_ready((out1, acc1, out2, acc2))

    ro1, ra1 = ref_step(accumulator, x1)
    ro2, ra2 = ref_step(ra1, x2)
    assert jnp.array_equal(out1, ro1), "step-1 output mismatch"
    assert jnp.array_equal(acc1, ra1), "step-1 accumulator state mismatch"
    assert jnp.array_equal(out2, ro2), "step-2 output mismatch"
    assert jnp.array_equal(acc2, ra2), "step-2 accumulator state mismatch"

    # --- Fused T-step path: accumulator resident in VMEM across the bitstream.
    outs, acc_final = uni2bi_forward_steps(xs, accumulator)
    jax.block_until_ready((outs, acc_final))

    acc_state = accumulator
    for t in range(T):
        ro, acc_state = ref_step(acc_state, xs[t])
        assert jnp.array_equal(outs[t], ro), f"fused step {t} output mismatch"
    assert jnp.array_equal(acc_final, acc_state), "fused final accumulator mismatch"

    print("KERNEL_OK")
</pallas_src>

<mosaic_0001>
module attributes {stable_mosaic.version = 11 : i64} {
  func.func @_uni2bi_scalar_acc_kernel(%arg0: i32, %arg1: memref<1xf32, #tpu.memory_space<smem>>, %arg2: memref<2x1024xf32, #tpu.memory_space<vmem>>, %arg3: memref<2x1024xf32, #tpu.memory_space<vmem>>, %arg4: memref<2x1024xf32, #tpu.memory_space<vmem>>) attributes {dimension_semantics = [#tpu.dimension_semantics<parallel>], iteration_bounds = array<i64: 1>, scalar_prefetch = 0 : i64, scratch_operands = 0 : i64, tpu.core_type = #tpu.core_type<tc>, window_params = [{transform_indices = @transform_0, window_bounds = array<i64: 1>}, {transform_indices = @transform_1, window_bounds = array<i64: 2, 1024>}, {transform_indices = @transform_2, window_bounds = array<i64: 2, 1024>}, {transform_indices = @transform_3, window_bounds = array<i64: 2, 1024>}]} {
    %c0 = arith.constant 0 : index
    %c0_0 = arith.constant 0 : index
    %0 = vector.load %arg2[%c0, %c0_0] : memref<2x1024xf32, #tpu.memory_space<vmem>>, vector<2x1024xf32>
    %c0_1 = arith.constant 0 : index
    %1 = memref.load %arg1[%c0_1] : memref<1xf32, #tpu.memory_space<smem>>
    %cst = arith.constant 1.000000e+00 : f32
    %2 = arith.addf %1, %cst : f32
    %3 = vector.broadcast %2 : f32 to vector<2x1024xf32>
    %4 = arith.addf %0, %3 : vector<2x1024xf32>
    %cst_2 = arith.constant 2.000000e+00 : f32
    %5 = vector.broadcast %cst_2 : f32 to vector<2x1024xf32>
    %6 = arith.cmpf oge, %4, %5 : vector<2x1024xf32>
    %7 = arith.extui %6 : vector<2x1024xi1> to vector<2x1024xi32>
    %8 = arith.sitofp %7 : vector<2x1024xi32> to vector<2x1024xf32>
    %c0_3 = arith.constant 0 : index
    %c0_4 = arith.constant 0 : index
    %9 = vector.load %arg3[%c0_3, %c0_4] : memref<2x1024xf32, #tpu.memory_space<vmem>>, vector<2x1024xf32>
    tpu.vector_store %arg3[%c0_3, %c0_4], %8 {strides = array<i32>} : memref<2x1024xf32, #tpu.memory_space<vmem>>, vector<2x1024xf32>,
    %cst_5 = arith.constant 2.000000e+00 : f32
    %10 = vector.broadcast %cst_5 : f32 to vector<2x1024xf32>
    %11 = arith.mulf %10, %8 : vector<2x1024xf32>
    %12 = arith.subf %4, %11 : vector<2x1024xf32>
    %c0_6 = arith.constant 0 : index
    %c0_7 = arith.constant 0 : index
    %13 = vector.load %arg4[%c0_6, %c0_7] : memref<2x1024xf32, #tpu.memory_space<vmem>>, vector<2x1024xf32>
    tpu.vector_store %arg4[%c0_6, %c0_7], %12 {strides = array<i32>} : memref<2x1024xf32, #tpu.memory_space<vmem>>, vector<2x1024xf32>,
    return
  }
  func.func @transform_0(%arg0: i32) -> i32 {
    %c0_i32 = arith.constant 0 : i32
    %c0_i32_0 = arith.constant 0 : i32
    return %c0_i32 : i32
  }
  func.func @transform_1(%arg0: i32) -> (i32, i32) {
    %c0_i32 = arith.constant 0 : i32
    %c0_i32_0 = arith.constant 0 : i32
    return %arg0, %c0_i32 : i32, i32
  }
  func.func @transform_2(%arg0: i32) -> (i32, i32) {
    %c0_i32 = arith.constant 0 : i32
    %c0_i32_0 = arith.constant 0 : i32
    return %arg0, %c0_i32 : i32, i32
  }
  func.func @transform_3(%arg0: i32) -> (i32, i32) {
    %c0_i32 = arith.constant 0 : i32
    %c0_i32_0 = arith.constant 0 : i32
    return %arg0, %c0_i32 : i32, i32
  }
}

</mosaic_0001>

<bundles_post_ra>
// kernel: tpu_custom_call.1
= control target key start
LH: loop header
LB: loop body
LE: loop exit
PB: predicated region body
PF: predicated region fallthrough
CT: control target
= control target key end

     0   :  { %10 = vsyncpa [#allocation4], 0  ;;  %s219_s0 = inlined_call_operand.<no memory space> [shape: f32[1], index: 0, kind: input, shape index: {}]   ;;  %s220_s1 = inlined_call_operand.hbm [shape: f32[2,1024], index: 1, kind: input, shape index: {}]   ;;  %s221_s2 = inlined_call_operand.hbm [shape: f32[2,1024], index: 2, kind: output, shape index: {0}]   ;;  %s222_s3 = inlined_call_operand.hbm [shape: f32[2,1024], index: 3, kind: output, shape index: {1}]  }
   0x1   :  { %11 = vsyncpa [#allocation5], 0 }
   0x2   :  { %12 = vsyncpa [#allocation8], 0  ;;  %s156_s12 = smov [#allocation3]   ;;  %s84_s16 = scalar_lea.hbm %s220_s1, 256 }
   0x3   :  { %s21_s13 = sshll.u32 %s156_s12, 4  ;;  %p85_p0 = scmp.ne.s32.totalorder %s220_s1, %s84_s16  ;;  %s22_s13 = int_to_ptr.vmem [resolvable:$true] %s21_s13 }
   0x4   :  { %p88_p1 = scmp.lt.u32.totalorder %s84_s16, %s220_s1 }
   0x6   :  { %p90_p2 = pnand %p88_p1, %p85_p0 }
   0x8   :  { %93 = shalt.err (!%p90_p2)
}
   0x9   :  { %s94_s21 = scalar_lea.vmem %s22_s13, 256  ;;  %p99_p4 = scmp.lt.s32.totalorder %s22_s13, %s22_s13 }
   0xa   :  { %p95_p3 = scmp.ne.s32.totalorder %s22_s13, %s94_s21  ;;  %p100_p5 = scmp.lt.s32.totalorder %s94_s21, %s94_s21 }
   0xc   :  { %p101_p6 = por %p100_p5, %p99_p4 }
   0xe   :  { %p102_p7 = pnand %p101_p6, %p95_p3 }
  0x10   :  { %105 = shalt.err (!%p102_p7)
}
  0x11   :  { %24 = dma.hbm_to_vmem [thread:$0]  %s220_s1, 256, %s22_s13, [#allocation4]  }
  0x12   :  { %150 = dma.done.wait [#allocation4], 256  }
  0x13   :  { %151 = vsyncadd [#allocation4], 4294967040  ;;  %s31_s26 = sadd.f32 1.0, %s219_s0  ;;  %v28_v1 = vld [vmem:[#allocation3] sm:$0xff]  ;;  %v29_v2 = vld [vmem:[#allocation3 + $0x8] sm:$0xff]  ;;  %s157_s27 = smov [#allocation6]  }
  0x14   :  { %s55_s28 = sshll.u32 %s157_s27, 4  ;;  %v158_v5 = vmov 0.0   ;;  %s159_s1 = smov [#allocation7]   ;;  %s56_s28 = int_to_ptr.vmem [resolvable:$true] %s55_s28 }
  0x15   :  { %v32_v0 = vstv %s31_s26  ;;  %s65_s29 = sshll.u32 %s159_s1, 4  ;;  %s106_s0 = scalar_lea.vmem %s56_s28, 256  ;;  %s66_s29 = int_to_ptr.vmem [resolvable:$true] %s65_s29 }
  0x16   :  { %v33_v3 = vadd.f32 %v32_v0, %v28_v1  ;;  %v34_v4 = vadd.f32 %v32_v0, %v29_v2  ;;  %p107_p8 = scmp.ne.s32.totalorder %s56_s28, %s106_s0  ;;  %p111_p9 = scmp.lt.s32.totalorder %s56_s28, %s56_s28 }
  0x17   :  { %p112_p10 = scmp.lt.s32.totalorder %s106_s0, %s106_s0 }
  0x18   :  { %vm35_vm0 = vcmp.ge.f32.partialorder %v33_v3, 2.0  ;;  %vm36_vm1 = vcmp.ge.f32.partialorder %v34_v4, 2.0 }
  0x19   :  { %v78_v6 = vsel %vm35_vm0, 1.0, %v158_v5  ;;  %v79_v7 = vsel %vm36_vm1, 1.0, %v158_v5  ;;  %p113_p11 = por %p112_p10, %p111_p9 }
  0x1a   :  { %41 = vst [vmem:[#allocation6] sm:$0xff] %v78_v6  ;;  %v43_v8 = vmul.f32 2.0, %v78_v6  ;;  %42 = vst [vmem:[#allocation6 + $0x8] sm:$0xff] %v79_v7  ;;  %v44_v9 = vmul.f32 2.0, %v79_v7 }
  0x1b   :  { %p114_p12 = pnand %p113_p11, %p107_p8 }
  0x1d   :  { %117 = shalt.err (!%p114_p12)
}
  0x1e   :  { %s118_s5 = scalar_lea.hbm %s221_s2, 256 }
  0x1f   :  { %p119_p13 = scmp.ne.s32.totalorder %s221_s2, %s118_s5  ;;  %p122_p0 = scmp.lt.u32.totalorder %s118_s5, %s221_s2 }
  0x21   :  { %p124_p1 = pnand %p122_p0, %p119_p13 }
  0x23   :  { %127 = shalt.err (!%p124_p1)
}
  0x24   :  { %58 = dma.vmem_to_hbm [thread:$0]  %s56_s28, 256, %s221_s2, [#allocation5]   ;;  %v45_v10 = vsub.f32 %v33_v3, %v43_v8  ;;  %v46_v11 = vsub.f32 %v34_v4, %v44_v9 }
  0x25   :  { %s128_s12 = scalar_lea.vmem %s66_s29, 256  ;;  %p133_p3 = scmp.lt.s32.totalorder %s66_s29, %s66_s29 }
  0x26   :  { %47 = vst [vmem:[#allocation7] sm:$0xff] %v45_v10  ;;  %48 = vst [vmem:[#allocation7 + $0x8] sm:$0xff] %v46_v11  ;;  %p129_p2 = scmp.ne.s32.totalorder %s66_s29, %s128_s12  ;;  %p134_p4 = scmp.lt.s32.totalorder %s128_s12, %s128_s12 }
  0x28   :  { %p135_p5 = por %p134_p4, %p133_p3 }
  0x2a   :  { %p136_p6 = pnand %p135_p5, %p129_p2 }
  0x2c   :  { %139 = shalt.err (!%p136_p6)
}
  0x2d   :  { %s140_s15 = scalar_lea.hbm %s222_s3, 256 }
  0x2e   :  { %p141_p7 = scmp.ne.s32.totalorder %s222_s3, %s140_s15  ;;  %p144_p8 = scmp.lt.u32.totalorder %s140_s15, %s222_s3 }
  0x30   :  { %p146_p9 = pnand %p144_p8, %p141_p7 }
  0x32   :  { %149 = shalt.err (!%p146_p9)
}
  0x33   :  { %68 = dma.vmem_to_hbm [thread:$0]  %s66_s29, 256, %s222_s3, [#allocation8]  }
  0x34   :  { %152 = dma.done.wait [#allocation5], 256  }
  0x35   :  { %153 = vsyncadd [#allocation5], 4294967040 }
  0x36   :  { %154 = dma.done.wait [#allocation8], 256  }
  0x37   :  { %155 = vsyncadd [#allocation8], 4294967040 }
  0x38   :  { %75 = vsyncpa [#allocation4], 1 }
  0x39   :  { %76 = vsyncpa [#allocation5], 1 }
  0x3a   :  { %77 = vsyncpa [#allocation8], 1 }

</bundles_post_ra>
